<compile_context>
chip_gen: v5e
topology: v5e:2x2
jax: 0.10.0
libtpu: 0.0.40
codegen_flags: <defaults>
</compile_context>

<pallas_src>
import jax
import jax.numpy as jnp
from jax.experimental import pallas as pl
from jax.experimental.pallas import tpu as pltpu


def _conv1x1_kernel(x_ref, w_ref, o_ref):
    # x_ref: (1, Cin, HW) input dtype   w_ref: (tile_o, Cin) bf16 (pre-cast)
    # o_ref: (1, tile_o, HW) input dtype
    x = x_ref[0].astype(jnp.bfloat16)
    o_ref[0] = jnp.dot(
        w_ref[...], x, preferred_element_type=jnp.float32
    ).astype(o_ref.dtype)


# Leave headroom under v7x's 32 MiB scoped-VMEM default (64 MiB physical).
_VMEM_BUDGET = 24 * 1024 * 1024


def _choose_cout_tile(cout: int, cin: int, hw: int, x_item: int, out_item: int) -> int:
    """Largest Cout tile whose (double-buffered) blocks fit the VMEM budget.

    Returns `cout` itself when the whole weight fits (preferred: single grid
    axis, weight DMA'd exactly once).  Otherwise prefers MXU-friendly tile
    sizes (multiples of 256, then 128, then 8) that divide Cout.
    """
    def fits(t: int) -> bool:
        w_b = 2 * t * cin * 2            # bf16 weight block, x2 buffering
        x_b = 2 * cin * hw * x_item      # activation block, x2 buffering
        o_b = 2 * t * hw * out_item      # output block, x2 buffering
        return (w_b + x_b + o_b) <= _VMEM_BUDGET

    if fits(cout):
        return cout
    for step in (256, 128, 8):
        start = cout - (cout % step)
        for t in range(start, step - 1, -step):
            if t > 0 and cout % t == 0 and fits(t):
                return t
    # TODO(synk): very large, non-divisible Cout may exceed the VMEM budget;
    # an HW grid axis would be the next lever.
    return cout


def conv2d_1x1(x_nchw: jax.Array, weight_oihw: jax.Array) -> jax.Array:
    """Conv2d(kernel=1x1, stride=1, bias=False) on NCHW input.

    weight_oihw has shape (C_out, C_in, 1, 1), matching torch.nn.Conv2d.
    """
    N, C, H, W = x_nchw.shape
    Cout = weight_oihw.shape[0]
    HW = H * W

    # Free (contiguous) reshapes only — no transposes, no extra HBM passes.
    x3 = x_nchw.reshape(N, C, HW)                      # (N, Cin, H*W)
    # Conv weights are reused across calls: pre-cast once to bf16 outside the
    # kernel (halves the dominant HBM stream); f32 accumulation inside.
    w2 = weight_oihw.reshape(Cout, C).astype(jnp.bfloat16)

    x_item = x_nchw.dtype.itemsize
    out_dtype = x_nchw.dtype
    out_item = jnp.dtype(out_dtype).itemsize

    tile_o = _choose_cout_tile(Cout, C, HW, x_item, out_item)

    cost = pl.CostEstimate(
        flops=2 * N * Cout * C * HW,
        transcendentals=0,
        bytes_accessed=(
            N * C * HW * x_item        # activation read (once)
            + Cout * C * 2             # bf16 weight read (exactly once)
            + N * Cout * HW * out_item  # output write
        ),
    )

    if tile_o == Cout:
        # Whole weight is VMEM-resident: single batch grid axis; the weight
        # block index is constant, so it is DMA'd exactly once.
        grid = (N,)
        in_specs = [
            pl.BlockSpec((1, C, HW), lambda n: (n, 0, 0)),
            pl.BlockSpec((Cout, C), lambda n: (0, 0)),
        ]
        out_specs = pl.BlockSpec((1, Cout, HW), lambda n: (n, 0, 0))
        dims = ("parallel",)
    else:
        # Weight too large for VMEM: stream Cout tiles on the OUTER axis so
        # each weight tile is read exactly once (constant along the inner
        # batch axis).  On v7x the core-parallel split lands on the Cout axis,
        # so each TensorCore reads a disjoint half of the weight.
        grid = (Cout // tile_o, N)
        in_specs = [
            pl.BlockSpec((1, C, HW), lambda j, n: (n, 0, 0)),
            pl.BlockSpec((tile_o, C), lambda j, n: (j, 0)),
        ]
        out_specs = pl.BlockSpec((1, tile_o, HW), lambda j, n: (n, j, 0))
        dims = ("parallel", "arbitrary")

    out3 = pl.pallas_call(
        _conv1x1_kernel,
        out_shape=jax.ShapeDtypeStruct((N, Cout, HW), out_dtype),
        grid=grid,
        in_specs=in_specs,
        out_specs=out_specs,
        compiler_params=pltpu.CompilerParams(
            dimension_semantics=dims,
            # Matches the v7x scoped default; raises the v5e default so the
            # budgeted blocks always fit with double-buffering.
            vmem_limit_bytes=32 * 1024 * 1024,
        ),
        cost_estimate=cost,
    )(x3, w2)

    # (N, Cout, H*W) -> (N, Cout, H, W): free reshape, already NCHW.
    return out3.reshape(N, Cout, H, W)


if __name__ == "__main__":
    # Small analogue of the module: Conv2d(Cin, Cout, 1x1, bias=False) on an
    # NCHW input with 14x14 spatial (module uses 1392->1392 on (1,1392,14,14)).
    N, C_IN, C_OUT, H, W = 2, 256, 256, 14, 14

    key = jax.random.PRNGKey(0)
    kx, kw = jax.random.split(key)
    x = jax.random.normal(kx, (N, C_IN, H, W), dtype=jnp.float32)
    weight = jax.random.normal(kw, (C_OUT, C_IN, 1, 1), dtype=jnp.float32) * 0.02

    out = jax.jit(conv2d_1x1)(x, weight)
    jax.block_until_ready(out)

    # Pure-JAX f32 reference.  The kernel uses bf16 operands with f32
    # accumulation, so use a correspondingly (still tight) tolerance.
    ref = jnp.einsum("oc,nchw->nohw", weight.reshape(C_OUT, C_IN), x)
    assert out.shape == (N, C_OUT, H, W)
    assert jnp.allclose(out, ref, atol=2e-2, rtol=2e-2), float(
        jnp.max(jnp.abs(out - ref))
    )

    print("KERNEL_OK")
</pallas_src>

<mosaic_0001>
module attributes {stable_mosaic.version = 11 : i64} {
  func.func @_conv1x1_kernel(%arg0: i32, %arg1: memref<1x256x196xf32, #tpu.memory_space<vmem>>, %arg2: memref<256x256xbf16, #tpu.memory_space<vmem>>, %arg3: memref<1x256x196xf32, #tpu.memory_space<vmem>>) attributes {dimension_semantics = [#tpu.dimension_semantics<parallel>], iteration_bounds = array<i64: 2>, scalar_prefetch = 0 : i64, scratch_operands = 0 : i64, tpu.core_type = #tpu.core_type<tc>, window_params = [{transform_indices = @transform_0, window_bounds = array<i64: 1, 256, 196>}, {pipeline_mode = #tpu.pipeline_mode<synchronous>, transform_indices = @transform_1, window_bounds = array<i64: 256, 256>}, {transform_indices = @transform_2, window_bounds = array<i64: 1, 256, 196>}]} {
    %c0 = arith.constant 0 : index
    %c0_0 = arith.constant 0 : index
    %c0_1 = arith.constant 0 : index
    %0 = vector.load %arg1[%c0, %c0_0, %c0_1] : memref<1x256x196xf32, #tpu.memory_space<vmem>>, vector<1x256x196xf32>
    %1 = vector.shape_cast %0 : vector<1x256x196xf32> to vector<256x196xf32>
    %2 = arith.truncf %1 : vector<256x196xf32> to vector<256x196xbf16>
    %c0_2 = arith.constant 0 : index
    %c0_3 = arith.constant 0 : index
    %3 = vector.load %arg2[%c0_2, %c0_3] : memref<256x256xbf16, #tpu.memory_space<vmem>>, vector<256x256xbf16>
    %cst = arith.constant dense<0.000000e+00> : vector<256x196xf32>
    %4 = tpu.matmul %3, %2, %cst {dimension_numbers = #tpu.dot_dimension_numbers<[1], [0], [0], [1], [0, 0, 1, 1], [], []>} : vector<256x256xbf16>, vector<256x196xbf16>, vector<256x196xf32> -> vector<256x196xf32>
    %c0_4 = arith.constant 0 : index
    %c0_5 = arith.constant 0 : index
    %c0_6 = arith.constant 0 : index
    %5 = vector.load %arg3[%c0_4, %c0_5, %c0_6] : memref<1x256x196xf32, #tpu.memory_space<vmem>>, vector<1x256x196xf32>
    %6 = vector.shape_cast %5 : vector<1x256x196xf32> to vector<256x196xf32>
    %7 = vector.shape_cast %4 : vector<256x196xf32> to vector<1x256x196xf32>
    tpu.vector_store %arg3[%c0_4, %c0_5, %c0_6], %7 {strides = array<i32>} : memref<1x256x196xf32, #tpu.memory_space<vmem>>, vector<1x256x196xf32>,
    return
  }
  func.func @transform_0(%arg0: i32) -> (i32, i32, i32) {
    %c0_i32 = arith.constant 0 : i32
    %c0_i32_0 = arith.constant 0 : i32
    %c0_i32_1 = arith.constant 0 : i32
    return %arg0, %c0_i32, %c0_i32_0 : i32, i32, i32
  }
  func.func @transform_1(%arg0: i32) -> (i32, i32) {
    %c0_i32 = arith.constant 0 : i32
    %c0_i32_0 = arith.constant 0 : i32
    %c0_i32_1 = arith.constant 0 : i32
    return %c0_i32, %c0_i32_0 : i32, i32
  }
  func.func @transform_2(%arg0: i32) -> (i32, i32, i32) {
    %c0_i32 = arith.constant 0 : i32
    %c0_i32_0 = arith.constant 0 : i32
    %c0_i32_1 = arith.constant 0 : i32
    return %arg0, %c0_i32, %c0_i32_0 : i32, i32, i32
  }
}

</mosaic_0001>

<bundles_post_ra>
// kernel: conv2d_1x1.1
= control target key start
LH: loop header
LB: loop body
LE: loop exit
PB: predicated region body
PF: predicated region fallthrough
CT: control target
= control target key end

     0   :  { %s1112_s9 = smov 0   ;;  %s1492_s0 = inlined_call_operand.vmem [shape: f32[2,256,196], index: 0, kind: input, shape index: {}]   ;;  %s1493_s1 = inlined_call_operand.vmem [shape: bf16[256,256], index: 1, kind: input, shape index: {}]   ;;  %s1494_s2 = inlined_call_operand.vmem [shape: f32[2,256,196], index: 2, kind: output, shape index: {}]  }
   0x1 LB: > { %s908_s10 = sadd.s32 4294967295, %s1095_s9   ;;  %p912_p0 = scmp.ge.s32.totalorder %s1095_s9, 1  ;;  %s1095_s9 = sphi %s1112_s9, %s12_s9  }
   0x2   : > { %p112_p1 = scmp.lt.s32.totalorder %s1095_s9, 3 }
   0x4   : > { %p113_p2 = pnand %p912_p0, %p112_p1 }
   0x5   : > { %p134_p3 = scmp.lt.s32.totalorder (!%p113_p2), %s908_s10, 1 }
   0x6   : > { %116 = sbr.rel (%p113_p2) target bundleno = 433 (0x1b1), region = 28 }
   0xb   : > { %s1496_s10 = smov (!%p134_p3, %s908_s10), 1  ;;  %vm789_vm0 = vcmask 556032  }
   0xc   : > { %s1047_s11 = sshll.u32 %s1496_s10, 9 }
   0xd   : > { %s1128_s14 = scalar_lea.vmem %s1492_s0, %s1047_s11 }
   0xe   : > { %v172_v0 = vld [vmem:[%s1128_s14 + $0xe0] sm:$0xff]  ;;  %v174_v1 = vld [vmem:[%s1128_s14 + $0xf0] sm:$0xff]  ;;  %v173_v5 = vld [vmem:[%s1128_s14 + $0xe8] sm:$0xff] }
   0xf   : > { %v204_v2 = vld [vmem:[%s1128_s14 + $0x1e0] sm:$0xff]  ;;  %v222_v3 = vpack.c.bf16 %v174_v1, %v172_v0  ;;  %v206_v4 = vld [vmem:[%s1128_s14 + $0x1f0] sm:$0xff]  ;;  %v175_v6 = vld [vmem:[%s1128_s14 + $0xf8] sm:$0xff] }
  0x10   : > { %v238_v7 = vpack.c.bf16 %v206_v4, %v204_v2  ;;  %v223_v8 = vpack.c.bf16 %v175_v6, %v173_v5  ;;  %v205_v9 = vld [vmem:[%s1128_s14 + $0x1e8] sm:$0xff]  ;;  %v207_v10 = vld [vmem:[%s1128_s14 + $0x1f8] sm:$0xff]  ;;  %v168_v11 = vld [vmem:[%s1128_s14 + $0xc0] sm:$0xff] }
  0x11   : > { %432 = vmatpush.bf16.msra.mxu0 %v222_v3  ;;  %v239_v12 = vpack.c.bf16 %v207_v10, %v205_v9  ;;  %v170_v13 = vld [vmem:[%s1128_s14 + $0xd0] sm:$0xff]  ;;  %v200_v14 = vld [vmem:[%s1128_s14 + $0x1c0] sm:$0xff]  ;;  %v169_v18 = vld [vmem:[%s1128_s14 + $0xc8] sm:$0xff] }
  0x12   : > { %v202_v15 = vld [vmem:[%s1128_s14 + $0x1d0] sm:$0xff]  ;;  %521 = vmatpush.bf16.msra.mxu1 %v238_v7  ;;  %610 = vmatpush.bf16.msra.mxu2 %v223_v8  ;;  %v220_v16 = vpack.c.bf16 %v170_v13, %v168_v11  ;;  %v171_v19 = vld [vmem:[%s1128_s14 + $0xd8] sm:$0xff]  ;;  %v201_v20 = vld [vmem:[%s1128_s14 + $0x1c8] sm:$0xff] }
  0x13   : > { %v236_v17 = vpack.c.bf16 %v202_v15, %v200_v14  ;;  %699 = vmatpush.bf16.msra.mxu3 %v239_v12  ;;  %v221_v21 = vpack.c.bf16 %v171_v19, %v169_v18  ;;  %v203_v22 = vld [vmem:[%s1128_s14 + $0x1d8] sm:$0xff]  ;;  %v164_v23 = vld [vmem:[%s1128_s14 + $0xa0] sm:$0xff]  ;;  %v166_v24 = vld [vmem:[%s1128_s14 + $0xb0] sm:$0xff] }
  0x14   : > { %v237_v25 = vpack.c.bf16 %v203_v22, %v201_v20  ;;  %v196_v26 = vld [vmem:[%s1128_s14 + $0x1a0] sm:$0xff]  ;;  %v198_v27 = vld [vmem:[%s1128_s14 + $0x1b0] sm:$0xff]  ;;  %v165_v28 = vld [vmem:[%s1128_s14 + $0xa8] sm:$0xff]  ;;  %v218_v29 = vpack.c.bf16 %v166_v24, %v164_v23 }
  0x15   : > { %433 = vmatpush.bf16.msra.mxu0 %v220_v16  ;;  %v167_v30 = vld [vmem:[%s1128_s14 + $0xb8] sm:$0xff]  ;;  %v197_v31 = vld [vmem:[%s1128_s14 + $0x1a8] sm:$0xff]  ;;  %v234_v33 = vpack.c.bf16 %v198_v27, %v196_v26  ;;  %v160_v35 = vld [vmem:[%s1128_s14 + $0x80] sm:$0xff] }
  0x16   : > { %v199_v32 = vld [vmem:[%s1128_s14 + $0x1b8] sm:$0xff]  ;;  %522 = vmatpush.bf16.msra.mxu1 %v236_v17  ;;  %611 = vmatpush.bf16.msra.mxu2 %v221_v21  ;;  %v219_v34 = vpack.c.bf16 %v167_v30, %v165_v28  ;;  %v162_v36 = vld [vmem:[%s1128_s14 + $0x90] sm:$0xff]  ;;  %v192_v37 = vld [vmem:[%s1128_s14 + $0x180] sm:$0xff] }
  0x17   : > { %700 = vmatpush.bf16.msra.mxu3 %v237_v25  ;;  %v235_v38 = vpack.c.bf16 %v199_v32, %v197_v31  ;;  %v194_v39 = vld [vmem:[%s1128_s14 + $0x190] sm:$0xff]  ;;  %v161_v40 = vld [vmem:[%s1128_s14 + $0x88] sm:$0xff]  ;;  %v163_v41 = vld [vmem:[%s1128_s14 + $0x98] sm:$0xff]  ;;  %v216_v44 = vpack.c.bf16 %v162_v36, %v160_v35 }
  0x18   : > { %v193_v42 = vld [vmem:[%s1128_s14 + $0x188] sm:$0xff]  ;;  %v195_v43 = vld [vmem:[%s1128_s14 + $0x198] sm:$0xff]  ;;  %v232_v45 = vpack.c.bf16 %v194_v39, %v192_v37  ;;  %v217_v46 = vpack.c.bf16 %v163_v41, %v161_v40  ;;  %v156_v47 = vld [vmem:[%s1128_s14 + $0x60] sm:$0xff] }
  0x19   : > { %434 = vmatpush.bf16.msra.mxu0 %v218_v29  ;;  %v158_v48 = vld [vmem:[%s1128_s14 + $0x70] sm:$0xff]  ;;  %v188_v49 = vld [vmem:[%s1128_s14 + $0x160] sm:$0xff]  ;;  %v233_v50 = vpack.c.bf16 %v195_v43, %v193_v42  ;;  %v157_v52 = vld [vmem:[%s1128_s14 + $0x68] sm:$0xff] }
  0x1a   : > { %523 = vmatpush.bf16.msra.mxu1 %v234_v33  ;;  %612 = vmatpush.bf16.msra.mxu2 %v219_v34  ;;  %v190_v51 = vld [vmem:[%s1128_s14 + $0x170] sm:$0xff]  ;;  %v159_v53 = vld [vmem:[%s1128_s14 + $0x78] sm:$0xff]  ;;  %v189_v54 = vld [vmem:[%s1128_s14 + $0x168] sm:$0xff]  ;;  %v214_v56 = vpack.c.bf16 %v158_v48, %v156_v47 }
  0x1b   : > { %701 = vmatpush.bf16.msra.mxu3 %v235_v38  ;;  %v191_v55 = vld [vmem:[%s1128_s14 + $0x178] sm:$0xff]  ;;  %v230_v57 = vpack.c.bf16 %v190_v51, %v188_v49  ;;  %v215_v58 = vpack.c.bf16 %v159_v53, %v157_v52  ;;  %v152_v59 = vld [vmem:[%s1128_s14 + $0x40] sm:$0xff]  ;;  %v154_v60 = vld [vmem:[%s1128_s14 + $0x50] sm:$0xff] }
  0x1c   : > { %v184_v61 = vld [vmem:[%s1128_s14 + $0x140] sm:$0xff]  ;;  %v231_v62 = vpack.c.bf16 %v191_v55, %v189_v54  ;;  %v186_v63 = vld [vmem:[%s1128_s14 + $0x150] sm:$0xff]  ;;  %v153_v0 = vld [vmem:[%s1128_s14 + $0x48] sm:$0xff]  ;;  %v212_v4 = vpack.c.bf16 %v154_v60, %v152_v59 }
  0x1d   : > { %435 = vmatpush.bf16.msra.mxu0 %v216_v44  ;;  %v155_v1 = vld [vmem:[%s1128_s14 + $0x58] sm:$0xff]  ;;  %v185_v2 = vld [vmem:[%s1128_s14 + $0x148] sm:$0xff]  ;;  %v228_v5 = vpack.c.bf16 %v186_v63, %v184_v61  ;;  %v148_v7 = vld [vmem:[%s1128_s14 + $0x20] sm:$0xff] }
  0x1e   : > { %524 = vmatpush.bf16.msra.mxu1 %v232_v45  ;;  %613 = vmatpush.bf16.msra.mxu2 %v217_v46  ;;  %v187_v3 = vld [vmem:[%s1128_s14 + $0x158] sm:$0xff]  ;;  %v213_v6 = vpack.c.bf16 %v155_v1, %v153_v0  ;;  %v150_v8 = vld [vmem:[%s1128_s14 + $0x30] sm:$0xff]  ;;  %v180_v9 = vld [vmem:[%s1128_s14 + $0x120] sm:$0xff] }
  0x1f   : > { %702 = vmatpush.bf16.msra.mxu3 %v233_v50  ;;  %v229_v10 = vpack.c.bf16 %v187_v3, %v185_v2  ;;  %v182_v11 = vld [vmem:[%s1128_s14 + $0x130] sm:$0xff]  ;;  %v149_v12 = vld [vmem:[%s1128_s14 + $0x28] sm:$0xff]  ;;  %v151_v13 = vld [vmem:[%s1128_s14 + $0x38] sm:$0xff]  ;;  %v210_v16 = vpack.c.bf16 %v150_v8, %v148_v7 }
  0x20   : > { %v181_v14 = vld [vmem:[%s1128_s14 + $0x128] sm:$0xff]  ;;  %v183_v15 = vld [vmem:[%s1128_s14 + $0x138] sm:$0xff]  ;;  %v226_v17 = vpack.c.bf16 %v182_v11, %v180_v9  ;;  %v211_v18 = vpack.c.bf16 %v151_v13, %v149_v12  ;;  %v144_v19 = vld [vmem:[%s1128_s14] sm:$0xff] }
  0x21   : > { %436 = vmatpush.bf16.msra.mxu0 %v214_v56  ;;  %v146_v20 = vld [vmem:[%s1128_s14 + $0x10] sm:$0xff]  ;;  %v176_v21 = vld [vmem:[%s1128_s14 + $0x100] sm:$0xff]  ;;  %v227_v22 = vpack.c.bf16 %v183_v15, %v181_v14  ;;  %v145_v24 = vld [vmem:[%s1128_s14 + $0x8] sm:$0xff] }
  0x22   : > { %525 = vmatpush.bf16.msra.mxu1 %v230_v57  ;;  %614 = vmatpush.bf16.msra.mxu2 %v215_v58  ;;  %v178_v23 = vld [vmem:[%s1128_s14 + $0x110] sm:$0xff]  ;;  %v147_v25 = vld [vmem:[%s1128_s14 + $0x18] sm:$0xff]  ;;  %v177_v26 = vld [vmem:[%s1128_s14 + $0x108] sm:$0xff]  ;;  %v208_v28 = vpack.c.bf16 %v146_v20, %v144_v19 }
  0x23   : > { %703 = vmatpush.bf16.msra.mxu3 %v231_v62  ;;  %v179_v27 = vld [vmem:[%s1128_s14 + $0x118] sm:$0xff]  ;;  %v919_v29 = vld [vmem:[%s1493_s1] sm:$0xf]  ;;  %v1050_v30 = vld [vmem:[%s1493_s1 + $0x4] sm:$0xf0]  ;;  %v224_v31 = vpack.c.bf16 %v178_v23, %v176_v21  ;;  %v209_v32 = vpack.c.bf16 %v147_v25, %v145_v24  ;;  %s1307_s14 = scalar_lea.vmem %s1494_s2, %s1047_s11 }
  0x24   : > { %v1049_v33 = vld [vmem:[%s1493_s1 + $0x4] sm:$0xf]  ;;  %v921_v34 = vld [vmem:[%s1493_s1 + $0x8] sm:$0xf0]  ;;  %v225_v35 = vpack.c.bf16 %v179_v27, %v177_v26  ;;  %v920_v36 = vor.u32 %v1050_v30, %v919_v29  ;;  %v927_v38 = vld [vmem:[%s1493_s1 + $0x10] sm:$0xf] }
  0x25   : > { %437 = vmatpush.bf16.msra.mxu0 %v212_v4  ;;  %v924_v37 = vor.u32 %v1049_v33, %v921_v34  ;;  %v1052_v39 = vld [vmem:[%s1493_s1 + $0x14] sm:$0xf0]  ;;  %v1051_v40 = vld [vmem:[%s1493_s1 + $0x14] sm:$0xf]  ;;  %v929_v41 = vld [vmem:[%s1493_s1 + $0x18] sm:$0xf0] }
  0x26   : > { %526 = vmatpush.bf16.msra.mxu1 %v228_v5  ;;  %615 = vmatpush.bf16.msra.mxu2 %v213_v6  ;;  %v928_v42 = vor.u32 %v1052_v39, %v927_v38  ;;  %v932_v43 = vor.u32 %v1051_v40, %v929_v41  ;;  %v935_v44 = vld [vmem:[%s1493_s1 + $0x20] sm:$0xf]  ;;  %v1054_v45 = vld [vmem:[%s1493_s1 + $0x24] sm:$0xf0]  ;;  %v1053_v46 = vld [vmem:[%s1493_s1 + $0x24] sm:$0xf] }
  0x27   : > { %704 = vmatpush.bf16.msra.mxu3 %v229_v10  ;;  %v937_v47 = vld [vmem:[%s1493_s1 + $0x28] sm:$0xf0]  ;;  %v936_v48 = vor.u32 %v1054_v45, %v935_v44  ;;  %v943_v50 = vld [vmem:[%s1493_s1 + $0x30] sm:$0xf]  ;;  %v1056_v51 = vld [vmem:[%s1493_s1 + $0x34] sm:$0xf0] }
  0x28   : > { %v940_v49 = vor.u32 %v1053_v46, %v937_v47  ;;  %v1055_v52 = vld [vmem:[%s1493_s1 + $0x34] sm:$0xf]  ;;  %v945_v53 = vld [vmem:[%s1493_s1 + $0x38] sm:$0xf0]  ;;  %v944_v54 = vor.u32 %v1056_v51, %v943_v50  ;;  %v951_v56 = vld [vmem:[%s1493_s1 + $0x40] sm:$0xf] }
  0x29   : > { %438 = vmatpush.bf16.msra.mxu0 %v210_v16  ;;  %v948_v55 = vor.u32 %v1055_v52, %v945_v53  ;;  %v1058_v57 = vld [vmem:[%s1493_s1 + $0x44] sm:$0xf0]  ;;  %v1057_v58 = vld [vmem:[%s1493_s1 + $0x44] sm:$0xf]  ;;  %v953_v59 = vld [vmem:[%s1493_s1 + $0x48] sm:$0xf0] }
  0x2a   : > { %527 = vmatpush.bf16.msra.mxu1 %v226_v17  ;;  %616 = vmatpush.bf16.msra.mxu2 %v211_v18  ;;  %v952_v60 = vor.u32 %v1058_v57, %v951_v56  ;;  %v956_v61 = vor.u32 %v1057_v58, %v953_v59  ;;  %v959_v62 = vld [vmem:[%s1493_s1 + $0x50] sm:$0xf]  ;;  %v1060_v63 = vld [vmem:[%s1493_s1 + $0x54] sm:$0xf0]  ;;  %v1059_v0 = vld [vmem:[%s1493_s1 + $0x54] sm:$0xf] }
  0x2b   : > { %705 = vmatpush.bf16.msra.mxu3 %v227_v22  ;;  %v961_v1 = vld [vmem:[%s1493_s1 + $0x58] sm:$0xf0]  ;;  %v960_v2 = vor.u32 %v1060_v63, %v959_v62  ;;  %v967_v4 = vld [vmem:[%s1493_s1 + $0x60] sm:$0xf]  ;;  %v1062_v5 = vld [vmem:[%s1493_s1 + $0x64] sm:$0xf0] }
  0x2c   : > { %v964_v3 = vor.u32 %v1059_v0, %v961_v1  ;;  %v1061_v6 = vld [vmem:[%s1493_s1 + $0x64] sm:$0xf]  ;;  %v969_v7 = vld [vmem:[%s1493_s1 + $0x68] sm:$0xf0]  ;;  %v968_v8 = vor.u32 %v1062_v5, %v967_v4  ;;  %v975_v10 = vld [vmem:[%s1493_s1 + $0x70] sm:$0xf] }
  0x2d   : > { %439 = vmatpush.bf16.msra.mxu0 %v208_v28  ;;  %v972_v9 = vor.u32 %v1061_v6, %v969_v7  ;;  %v1064_v11 = vld [vmem:[%s1493_s1 + $0x74] sm:$0xf0]  ;;  %v1063_v12 = vld [vmem:[%s1493_s1 + $0x74] sm:$0xf]  ;;  %v977_v13 = vld [vmem:[%s1493_s1 + $0x78] sm:$0xf0] }
  0x2e   : > { %528 = vmatpush.bf16.msra.mxu1 %v224_v31  ;;  %617 = vmatpush.bf16.msra.mxu2 %v209_v32  ;;  %v976_v14 = vor.u32 %v1064_v11, %v975_v10  ;;  %v980_v15 = vor.u32 %v1063_v12, %v977_v13  ;;  %v983_v16 = vld [vmem:[%s1493_s1 + $0x80] sm:$0xf]  ;;  %v1066_v17 = vld [vmem:[%s1493_s1 + $0x84] sm:$0xf0]  ;;  %v1065_v18 = vld [vmem:[%s1493_s1 + $0x84] sm:$0xf] }
  0x2f   : > { %706 = vmatpush.bf16.msra.mxu3 %v225_v35  ;;  %v985_v19 = vld [vmem:[%s1493_s1 + $0x88] sm:$0xf0]  ;;  %v984_v20 = vor.u32 %v1066_v17, %v983_v16  ;;  %v991_v31 = vld [vmem:[%s1493_s1 + $0x90] sm:$0xf]  ;;  %v1068_v32 = vld [vmem:[%s1493_s1 + $0x94] sm:$0xf0] }
  0x30   : > { %440 = vmatmul.bf16.vlgmr.msra.gmra.mxu0 %v920_v36  ;;  %v988_v22 = vor.u32 %v1065_v18, %v985_v19  ;;  %v1067_v33 = vld [vmem:[%s1493_s1 + $0x94] sm:$0xf]  ;;  %v993_v34 = vld [vmem:[%s1493_s1 + $0x98] sm:$0xf0]  ;;  %v1070_v50 = vld [vmem:[%s1493_s1 + $0xa4] sm:$0xf0] }
  0x31   : > { %529 = vmatmul.bf16.vlgmr.msra.gmra.mxu1 %v924_v37  ;;  %618 = vmatmul.bf16.vlgmr.msra.gmra.mxu2 %v920_v36  ;;  %v992_v36 = vor.u32 %v1068_v32, %v991_v31  ;;  %v996_v39 = vor.u32 %v1067_v33, %v993_v34  ;;  %v1069_v51 = vld [vmem:[%s1493_s1 + $0xa4] sm:$0xf]  ;;  %v1001_v52 = vld [vmem:[%s1493_s1 + $0xa8] sm:$0xf0]  ;;  %v1072_v4 = vld [vmem:[%s1493_s1 + $0xb4] sm:$0xf0] }
  0x32   : > { %707 = vmatmul.bf16.vlgmr.msra.gmra.mxu3 %v924_v37  ;;  %v1004_v57 = vor.u32 %v1069_v51, %v1001_v52  ;;  %v1071_v5 = vld [vmem:[%s1493_s1 + $0xb4] sm:$0xf]  ;;  %v1009_v6 = vld [vmem:[%s1493_s1 + $0xb8] sm:$0xf0] }
  0x33   : > { %v1012_v11 = vor.u32 %v1071_v5, %v1009_v6 }
  0x40   : > { %445 = vmatmul.bf16.gmra.mxu0 %v928_v42 }
  0x41   : > { %534 = vmatmul.bf16.gmra.mxu1 %v932_v43  ;;  %623 = vmatmul.bf16.gmra.mxu2 %v928_v42 }
  0x42   : > { %712 = vmatmul.bf16.gmra.mxu3 %v932_v43 }
  0x50   : > { %450 = vmatmul.bf16.gmra.mxu0 %v936_v48 }
  0x51   : > { %539 = vmatmul.bf16.gmra.mxu1 %v940_v49  ;;  %628 = vmatmul.bf16.gmra.mxu2 %v936_v48 }
  0x52   : > { %717 = vmatmul.bf16.gmra.mxu3 %v940_v49  ;;  %v999_v49 = vld [vmem:[%s1493_s1 + $0xa0] sm:$0xf] }
  0x60   : > { %455 = vmatmul.bf16.gmra.mxu0 %v944_v54 }
  0x61   : > { %544 = vmatmul.bf16.gmra.mxu1 %v948_v55  ;;  %633 = vmatmul.bf16.gmra.mxu2 %v944_v54  ;;  %v1000_v54 = vor.u32 %v1070_v50, %v999_v49 }
  0x62   : > { %722 = vmatmul.bf16.gmra.mxu3 %v948_v55 }
  0x70   : > { %460 = vmatmul.bf16.gmra.mxu0 %v952_v60 }
  0x71   : > { %549 = vmatmul.bf16.gmra.mxu1 %v956_v61  ;;  %638 = vmatmul.bf16.gmra.mxu2 %v952_v60 }
  0x72   : > { %727 = vmatmul.bf16.gmra.mxu3 %v956_v61 }
  0x80   : > { %465 = vmatmul.bf16.gmra.mxu0 %v960_v2 }
  0x81   : > { %554 = vmatmul.bf16.gmra.mxu1 %v964_v3  ;;  %643 = vmatmul.bf16.gmra.mxu2 %v960_v2 }
  0x82   : > { %732 = vmatmul.bf16.gmra.mxu3 %v964_v3  ;;  %v1007_v3 = vld [vmem:[%s1493_s1 + $0xb0] sm:$0xf] }
  0x90   : > { %470 = vmatmul.bf16.gmra.mxu0 %v968_v8 }
  0x91   : > { %559 = vmatmul.bf16.gmra.mxu1 %v972_v9  ;;  %648 = vmatmul.bf16.gmra.mxu2 %v968_v8  ;;  %v1008_v8 = vor.u32 %v1072_v4, %v1007_v3 }
  0x92   : > { %737 = vmatmul.bf16.gmra.mxu3 %v972_v9 }
  0xa0   : > { %475 = vmatmul.bf16.gmra.mxu0 %v976_v14 }
  0xa1   : > { %564 = vmatmul.bf16.gmra.mxu1 %v980_v15  ;;  %653 = vmatmul.bf16.gmra.mxu2 %v976_v14 }
  0xa2   : > { %742 = vmatmul.bf16.gmra.mxu3 %v980_v15 }
  0xad   : > { %v441_v21 = vpop.f32.mrf.mxu0 }
  0xae   : > { %v530_v23 = vpop.f32.mrf.mxu1 }
  0xaf   : > { %v531_v24 = vadd.f32 %v530_v23, %v441_v21  ;;  %v1015_v21 = vld [vmem:[%s1493_s1 + $0xc0] sm:$0xf]  ;;  %v1073_v23 = vld [vmem:[%s1493_s1 + $0xc4] sm:$0xf] }
  0xb0   : > { %480 = vmatmul.bf16.gmra.mxu0 %v984_v20 }
  0xb1   : > { %788 = vst [vmem:[%s1307_s14] sm:$0xff] %v531_v24  ;;  %569 = vmatmul.bf16.gmra.mxu1 %v988_v22  ;;  %658 = vmatmul.bf16.gmra.mxu2 %v984_v20  ;;  %v1017_v24 = vld [vmem:[%s1493_s1 + $0xc8] sm:$0xf0] }
  0xb2   : > { %747 = vmatmul.bf16.gmra.mxu3 %v988_v22  ;;  %v1074_v22 = vld [vmem:[%s1493_s1 + $0xc4] sm:$0xf0] }
  0xb4   : > { %v619_v25 = vpop.f32.mrf.mxu2 }
  0xb5   : > { %v708_v26 = vpop.f32.mrf.mxu3  ;;  %v443_v27 = vpop.f32.mrf.mxu0 }
  0xb6   : > { %v709_v28 = vadd.f32 %v708_v26, %v619_v25  ;;  %v532_v29 = vpop.f32.mrf.mxu1  ;;  %v1016_v26 = vor.u32 %v1074_v22, %v1015_v21 }
  0xb7   : > { %v533_v30 = vadd.f32 %v532_v29, %v443_v27  ;;  %v1020_v29 = vor.u32 %v1073_v23, %v1017_v24 }
  0xb8   : > { %790 = vst.msk [vmem:[%s1307_s14 + $0x8] sm:$0xff] %vm789_vm0, %v709_v28 }
  0xb9   : > { %791 = vst [vmem:[%s1307_s14 + $0x10] sm:$0xff] %v533_v30 }
  0xbc   : > { %v621_v35 = vpop.f32.mrf.mxu2 }
  0xbd   : > { %v710_v37 = vpop.f32.mrf.mxu3  ;;  %v446_v38 = vpop.f32.mrf.mxu0 }
  0xbe   : > { %v711_v40 = vadd.f32 %v710_v37, %v621_v35  ;;  %v535_v41 = vpop.f32.mrf.mxu1 }
  0xbf   : > { %v536_v42 = vadd.f32 %v535_v41, %v446_v38  ;;  %v1075_v41 = vld [vmem:[%s1493_s1 + $0xd4] sm:$0xf] }
  0xc0   : > { %792 = vst.msk [vmem:[%s1307_s14 + $0x18] sm:$0xff] %vm789_vm0, %v711_v40  ;;  %485 = vmatmul.bf16.gmra.mxu0 %v992_v36  ;;  %v1076_v40 = vld [vmem:[%s1493_s1 + $0xd4] sm:$0xf0] }
  0xc1   : > { %793 = vst [vmem:[%s1307_s14 + $0x20] sm:$0xff] %v536_v42  ;;  %574 = vmatmul.bf16.gmra.mxu1 %v996_v39  ;;  %663 = vmatmul.bf16.gmra.mxu2 %v992_v36  ;;  %v1025_v42 = vld [vmem:[%s1493_s1 + $0xd8] sm:$0xf0] }
  0xc2   : > { %752 = vmatmul.bf16.gmra.mxu3 %v996_v39  ;;  %v1023_v39 = vld [vmem:[%s1493_s1 + $0xd0] sm:$0xf] }
  0xc4   : > { %v624_v43 = vpop.f32.mrf.mxu2 }
  0xc5   : > { %v713_v44 = vpop.f32.mrf.mxu3  ;;  %v448_v45 = vpop.f32.mrf.mxu0 }
  0xc6   : > { %v714_v46 = vadd.f32 %v713_v44, %v624_v43  ;;  %v537_v47 = vpop.f32.mrf.mxu1  ;;  %v1024_v44 = vor.u32 %v1076_v40, %v1023_v39 }
  0xc7   : > { %v538_v48 = vadd.f32 %v537_v47, %v448_v45  ;;  %v1028_v47 = vor.u32 %v1075_v41, %v1025_v42 }
  0xc8   : > { %794 = vst.msk [vmem:[%s1307_s14 + $0x28] sm:$0xff] %vm789_vm0, %v714_v46 }
  0xc9   : > { %795 = vst [vmem:[%s1307_s14 + $0x30] sm:$0xff] %v538_v48 }
  0xcc   : > { %v626_v53 = vpop.f32.mrf.mxu2 }
  0xcd   : > { %v715_v55 = vpop.f32.mrf.mxu3  ;;  %v451_v56 = vpop.f32.mrf.mxu0 }
  0xce   : > { %v716_v58 = vadd.f32 %v715_v55, %v626_v53  ;;  %v540_v59 = vpop.f32.mrf.mxu1 }
  0xcf   : > { %v541_v60 = vadd.f32 %v540_v59, %v451_v56  ;;  %v1077_v59 = vld [vmem:[%s1493_s1 + $0xe4] sm:$0xf] }
  0xd0   : > { %796 = vst.msk [vmem:[%s1307_s14 + $0x38] sm:$0xff] %vm789_vm0, %v716_v58  ;;  %490 = vmatmul.bf16.gmra.mxu0 %v1000_v54  ;;  %v1078_v58 = vld [vmem:[%s1493_s1 + $0xe4] sm:$0xf0] }
  0xd1   : > { %797 = vst [vmem:[%s1307_s14 + $0x40] sm:$0xff] %v541_v60  ;;  %579 = vmatmul.bf16.gmra.mxu1 %v1004_v57  ;;  %668 = vmatmul.bf16.gmra.mxu2 %v1000_v54  ;;  %v1033_v60 = vld [vmem:[%s1493_s1 + $0xe8] sm:$0xf0] }
  0xd2   : > { %757 = vmatmul.bf16.gmra.mxu3 %v1004_v57  ;;  %v1031_v57 = vld [vmem:[%s1493_s1 + $0xe0] sm:$0xf] }
  0xd4   : > { %v629_v61 = vpop.f32.mrf.mxu2 }
  0xd5   : > { %v718_v62 = vpop.f32.mrf.mxu3  ;;  %v453_v63 = vpop.f32.mrf.mxu0 }
  0xd6   : > { %v719_v0 = vadd.f32 %v718_v62, %v629_v61  ;;  %v542_v1 = vpop.f32.mrf.mxu1  ;;  %v1032_v62 = vor.u32 %v1078_v58, %v1031_v57 }
  0xd7   : > { %v543_v2 = vadd.f32 %v542_v1, %v453_v63  ;;  %v1036_v1 = vor.u32 %v1077_v59, %v1033_v60 }
  0xd8   : > { %798 = vst.msk [vmem:[%s1307_s14 + $0x48] sm:$0xff] %vm789_vm0, %v719_v0 }
  0xd9   : > { %799 = vst [vmem:[%s1307_s14 + $0x50] sm:$0xff] %v543_v2 }
  0xdc   : > { %v631_v7 = vpop.f32.mrf.mxu2 }
  0xdd   : > { %v720_v9 = vpop.f32.mrf.mxu3  ;;  %v456_v10 = vpop.f32.mrf.mxu0 }
  0xde   : > { %v721_v12 = vadd.f32 %v720_v9, %v631_v7  ;;  %v545_v13 = vpop.f32.mrf.mxu1 }
  0xdf   : > { %v546_v14 = vadd.f32 %v545_v13, %v456_v10  ;;  %v1079_v13 = vld [vmem:[%s1493_s1 + $0xf4] sm:$0xf] }
  0xe0   : > { %800 = vst.msk [vmem:[%s1307_s14 + $0x58] sm:$0xff] %vm789_vm0, %v721_v12  ;;  %495 = vmatmul.bf16.gmra.mxu0 %v1008_v8  ;;  %v1080_v12 = vld [vmem:[%s1493_s1 + $0xf4] sm:$0xf0] }
  0xe1   : > { %801 = vst [vmem:[%s1307_s14 + $0x60] sm:$0xff] %v546_v14  ;;  %584 = vmatmul.bf16.gmra.mxu1 %v1012_v11  ;;  %673 = vmatmul.bf16.gmra.mxu2 %v1008_v8  ;;  %v1041_v14 = vld [vmem:[%s1493_s1 + $0xf8] sm:$0xf0] }
  0xe2   : > { %762 = vmatmul.bf16.gmra.mxu3 %v1012_v11  ;;  %v1039_v11 = vld [vmem:[%s1493_s1 + $0xf0] sm:$0xf] }
  0xe4   : > { %v634_v15 = vpop.f32.mrf.mxu2 }
  0xe5   : > { %v723_v16 = vpop.f32.mrf.mxu3  ;;  %v458_v17 = vpop.f32.mrf.mxu0 }
  0xe6   : > { %v724_v18 = vadd.f32 %v723_v16, %v634_v15  ;;  %v547_v19 = vpop.f32.mrf.mxu1  ;;  %v1040_v16 = vor.u32 %v1080_v12, %v1039_v11 }
  0xe7   : > { %v548_v20 = vadd.f32 %v547_v19, %v458_v17  ;;  %v1044_v19 = vor.u32 %v1079_v13, %v1041_v14 }
  0xe8   : > { %802 = vst.msk [vmem:[%s1307_s14 + $0x68] sm:$0xff] %vm789_vm0, %v724_v18 }
  0xe9   : > { %803 = vst [vmem:[%s1307_s14 + $0x70] sm:$0xff] %v548_v20 }
  0xec   : > { %v636_v25 = vpop.f32.mrf.mxu2 }
  0xed   : > { %v725_v27 = vpop.f32.mrf.mxu3  ;;  %v461_v28 = vpop.f32.mrf.mxu0 }
  0xee   : > { %v726_v30 = vadd.f32 %v725_v27, %v636_v25  ;;  %v550_v31 = vpop.f32.mrf.mxu1 }
  0xef   : > { %v551_v32 = vadd.f32 %v550_v31, %v461_v28 }
  0xf0   : > { %804 = vst.msk [vmem:[%s1307_s14 + $0x78] sm:$0xff] %vm789_vm0, %v726_v30  ;;  %500 = vmatmul.bf16.gmra.mxu0 %v1016_v26 }
  0xf1   : > { %805 = vst [vmem:[%s1307_s14 + $0x80] sm:$0xff] %v551_v32  ;;  %589 = vmatmul.bf16.gmra.mxu1 %v1020_v29  ;;  %678 = vmatmul.bf16.gmra.mxu2 %v1016_v26 }
  0xf2   : > { %767 = vmatmul.bf16.gmra.mxu3 %v1020_v29 }
  0xf4   : > { %v639_v33 = vpop.f32.mrf.mxu2 }
  0xf5   : > { %v728_v34 = vpop.f32.mrf.mxu3  ;;  %v463_v35 = vpop.f32.mrf.mxu0 }
  0xf6   : > { %v729_v36 = vadd.f32 %v728_v34, %v639_v33  ;;  %v552_v37 = vpop.f32.mrf.mxu1 }
  0xf7   : > { %v553_v38 = vadd.f32 %v552_v37, %v463_v35 }
  0xf8   : > { %806 = vst.msk [vmem:[%s1307_s14 + $0x88] sm:$0xff] %vm789_vm0, %v729_v36 }
  0xf9   : > { %807 = vst [vmem:[%s1307_s14 + $0x90] sm:$0xff] %v553_v38 }
  0xfc   : > { %v641_v43 = vpop.f32.mrf.mxu2 }
  0xfd   : > { %v730_v45 = vpop.f32.mrf.mxu3  ;;  %v466_v46 = vpop.f32.mrf.mxu0 }
  0xfe   : > { %v731_v48 = vadd.f32 %v730_v45, %v641_v43  ;;  %v555_v49 = vpop.f32.mrf.mxu1 }
  0xff   : > { %v556_v50 = vadd.f32 %v555_v49, %v466_v46 }
 0x100   : > { %808 = vst.msk [vmem:[%s1307_s14 + $0x98] sm:$0xff] %vm789_vm0, %v731_v48  ;;  %505 = vmatmul.bf16.gmra.mxu0 %v1024_v44 }
 0x101   : > { %809 = vst [vmem:[%s1307_s14 + $0xa0] sm:$0xff] %v556_v50  ;;  %594 = vmatmul.bf16.gmra.mxu1 %v1028_v47  ;;  %683 = vmatmul.bf16.gmra.mxu2 %v1024_v44 }
 0x102   : > { %772 = vmatmul.bf16.gmra.mxu3 %v1028_v47 }
 0x104   : > { %v644_v51 = vpop.f32.mrf.mxu2 }
 0x105   : > { %v733_v52 = vpop.f32.mrf.mxu3  ;;  %v468_v53 = vpop.f32.mrf.mxu0 }
 0x106   : > { %v734_v54 = vadd.f32 %v733_v52, %v644_v51  ;;  %v557_v55 = vpop.f32.mrf.mxu1 }
 0x107   : > { %v558_v56 = vadd.f32 %v557_v55, %v468_v53 }
 0x108   : > { %810 = vst.msk [vmem:[%s1307_s14 + $0xa8] sm:$0xff] %vm789_vm0, %v734_v54 }
 0x109   : > { %811 = vst [vmem:[%s1307_s14 + $0xb0] sm:$0xff] %v558_v56 }
 0x10c   : > { %v646_v61 = vpop.f32.mrf.mxu2 }
 0x10d   : > { %v735_v63 = vpop.f32.mrf.mxu3  ;;  %v471_v0 = vpop.f32.mrf.mxu0 }
 0x10e   : > { %v736_v2 = vadd.f32 %v735_v63, %v646_v61  ;;  %v560_v3 = vpop.f32.mrf.mxu1 }
 0x10f   : > { %v561_v4 = vadd.f32 %v560_v3, %v471_v0 }
 0x110   : > { %812 = vst.msk [vmem:[%s1307_s14 + $0xb8] sm:$0xff] %vm789_vm0, %v736_v2  ;;  %510 = vmatmul.bf16.gmra.mxu0 %v1032_v62 }
 0x111   : > { %813 = vst [vmem:[%s1307_s14 + $0xc0] sm:$0xff] %v561_v4  ;;  %599 = vmatmul.bf16.gmra.mxu1 %v1036_v1  ;;  %688 = vmatmul.bf16.gmra.mxu2 %v1032_v62 }
 0x112   : > { %777 = vmatmul.bf16.gmra.mxu3 %v1036_v1 }
 0x114   : > { %v649_v5 = vpop.f32.mrf.mxu2 }
 0x115   : > { %v738_v6 = vpop.f32.mrf.mxu3  ;;  %v473_v7 = vpop.f32.mrf.mxu0 }
 0x116   : > { %v739_v8 = vadd.f32 %v738_v6, %v649_v5  ;;  %v562_v9 = vpop.f32.mrf.mxu1 }
 0x117   : > { %v563_v10 = vadd.f32 %v562_v9, %v473_v7 }
 0x118   : > { %814 = vst.msk [vmem:[%s1307_s14 + $0xc8] sm:$0xff] %vm789_vm0, %v739_v8 }
 0x119   : > { %815 = vst [vmem:[%s1307_s14 + $0xd0] sm:$0xff] %v563_v10 }
 0x11c   : > { %v651_v15 = vpop.f32.mrf.mxu2 }
 0x11d   : > { %v740_v17 = vpop.f32.mrf.mxu3  ;;  %v476_v18 = vpop.f32.mrf.mxu0 }
 0x11e   : > { %v741_v20 = vadd.f32 %v740_v17, %v651_v15  ;;  %v565_v21 = vpop.f32.mrf.mxu1 }
 0x11f   : > { %v566_v22 = vadd.f32 %v565_v21, %v476_v18 }
 0x120   : > { %816 = vst.msk [vmem:[%s1307_s14 + $0xd8] sm:$0xff] %vm789_vm0, %v741_v20  ;;  %515 = vmatmul.bf16.gmra.mxu0 %v1040_v16 }
 0x121   : > { %817 = vst [vmem:[%s1307_s14 + $0xe0] sm:$0xff] %v566_v22  ;;  %604 = vmatmul.bf16.gmra.mxu1 %v1044_v19  ;;  %693 = vmatmul.bf16.gmra.mxu2 %v1040_v16 }
 0x122   : > { %782 = vmatmul.bf16.gmra.mxu3 %v1044_v19 }
 0x124   : > { %v654_v23 = vpop.f32.mrf.mxu2 }
 0x125   : > { %v743_v24 = vpop.f32.mrf.mxu3  ;;  %v478_v25 = vpop.f32.mrf.mxu0 }
 0x126   : > { %v744_v26 = vadd.f32 %v743_v24, %v654_v23  ;;  %v567_v27 = vpop.f32.mrf.mxu1 }
 0x127   : > { %v568_v28 = vadd.f32 %v567_v27, %v478_v25 }
 0x128   : > { %818 = vst.msk [vmem:[%s1307_s14 + $0xe8] sm:$0xff] %vm789_vm0, %v744_v26 }
 0x129   : > { %819 = vst [vmem:[%s1307_s14 + $0xf0] sm:$0xff] %v568_v28 }
 0x12c   : > { %v656_v29 = vpop.f32.mrf.mxu2 }
 0x12d   : > { %v745_v30 = vpop.f32.mrf.mxu3  ;;  %v481_v31 = vpop.f32.mrf.mxu0 }
 0x12e   : > { %v746_v32 = vadd.f32 %v745_v30, %v656_v29  ;;  %v570_v33 = vpop.f32.mrf.mxu1 }
 0x12f   : > { %v571_v34 = vadd.f32 %v570_v33, %v481_v31 }
 0x130   : > { %820 = vst.msk [vmem:[%s1307_s14 + $0xf8] sm:$0xff] %vm789_vm0, %v746_v32 }
 0x131   : > { %821 = vst [vmem:[%s1307_s14 + $0x100] sm:$0xff] %v571_v34 }
 0x134   : > { %v659_v35 = vpop.f32.mrf.mxu2 }
 0x135   : > { %v748_v36 = vpop.f32.mrf.mxu3  ;;  %v483_v37 = vpop.f32.mrf.mxu0 }
 0x136   : > { %v749_v38 = vadd.f32 %v748_v36, %v659_v35  ;;  %v572_v39 = vpop.f32.mrf.mxu1 }
 0x137   : > { %v573_v40 = vadd.f32 %v572_v39, %v483_v37 }
 0x138   : > { %822 = vst.msk [vmem:[%s1307_s14 + $0x108] sm:$0xff] %vm789_vm0, %v749_v38 }
 0x139   : > { %823 = vst [vmem:[%s1307_s14 + $0x110] sm:$0xff] %v573_v40 }
 0x13c   : > { %v661_v41 = vpop.f32.mrf.mxu2 }
 0x13d   : > { %v750_v42 = vpop.f32.mrf.mxu3  ;;  %v486_v43 = vpop.f32.mrf.mxu0 }
 0x13e   : > { %v751_v44 = vadd.f32 %v750_v42, %v661_v41  ;;  %v575_v45 = vpop.f32.mrf.mxu1 }
 0x13f   : > { %v576_v46 = vadd.f32 %v575_v45, %v486_v43 }
 0x140   : > { %824 = vst.msk [vmem:[%s1307_s14 + $0x118] sm:$0xff] %vm789_vm0, %v751_v44 }
 0x141   : > { %825 = vst [vmem:[%s1307_s14 + $0x120] sm:$0xff] %v576_v46 }
 0x144   : > { %v664_v47 = vpop.f32.mrf.mxu2 }
 0x145   : > { %v753_v48 = vpop.f32.mrf.mxu3  ;;  %v488_v49 = vpop.f32.mrf.mxu0 }
 0x146   : > { %v754_v50 = vadd.f32 %v753_v48, %v664_v47  ;;  %v577_v51 = vpop.f32.mrf.mxu1 }
 0x147   : > { %v578_v52 = vadd.f32 %v577_v51, %v488_v49 }
 0x148   : > { %826 = vst.msk [vmem:[%s1307_s14 + $0x128] sm:$0xff] %vm789_vm0, %v754_v50 }
 0x149   : > { %827 = vst [vmem:[%s1307_s14 + $0x130] sm:$0xff] %v578_v52 }
 0x14c   : > { %v666_v53 = vpop.f32.mrf.mxu2 }
 0x14d   : > { %v755_v54 = vpop.f32.mrf.mxu3  ;;  %v491_v55 = vpop.f32.mrf.mxu0 }
 0x14e   : > { %v756_v56 = vadd.f32 %v755_v54, %v666_v53  ;;  %v580_v57 = vpop.f32.mrf.mxu1 }
 0x14f   : > { %v581_v58 = vadd.f32 %v580_v57, %v491_v55 }
 0x150   : > { %828 = vst.msk [vmem:[%s1307_s14 + $0x138] sm:$0xff] %vm789_vm0, %v756_v56 }
 0x151   : > { %829 = vst [vmem:[%s1307_s14 + $0x140] sm:$0xff] %v581_v58 }
 0x154   : > { %v669_v59 = vpop.f32.mrf.mxu2 }
 0x155   : > { %v758_v60 = vpop.f32.mrf.mxu3  ;;  %v493_v61 = vpop.f32.mrf.mxu0 }
 0x156   : > { %v759_v62 = vadd.f32 %v758_v60, %v669_v59  ;;  %v582_v63 = vpop.f32.mrf.mxu1 }
 0x157   : > { %v583_v0 = vadd.f32 %v582_v63, %v493_v61 }
 0x158   : > { %830 = vst.msk [vmem:[%s1307_s14 + $0x148] sm:$0xff] %vm789_vm0, %v759_v62 }
 0x159   : > { %831 = vst [vmem:[%s1307_s14 + $0x150] sm:$0xff] %v583_v0 }
 0x15c   : > { %v671_v1 = vpop.f32.mrf.mxu2 }
 0x15d   : > { %v760_v2 = vpop.f32.mrf.mxu3  ;;  %v496_v3 = vpop.f32.mrf.mxu0 }
 0x15e   : > { %v761_v4 = vadd.f32 %v760_v2, %v671_v1  ;;  %v585_v5 = vpop.f32.mrf.mxu1 }
 0x15f   : > { %v586_v6 = vadd.f32 %v585_v5, %v496_v3 }
 0x160   : > { %832 = vst.msk [vmem:[%s1307_s14 + $0x158] sm:$0xff] %vm789_vm0, %v761_v4 }
 0x161   : > { %833 = vst [vmem:[%s1307_s14 + $0x160] sm:$0xff] %v586_v6 }
 0x164   : > { %v674_v7 = vpop.f32.mrf.mxu2 }
 0x165   : > { %v763_v8 = vpop.f32.mrf.mxu3  ;;  %v498_v9 = vpop.f32.mrf.mxu0 }
 0x166   : > { %v764_v10 = vadd.f32 %v763_v8, %v674_v7  ;;  %v587_v11 = vpop.f32.mrf.mxu1 }
 0x167   : > { %v588_v12 = vadd.f32 %v587_v11, %v498_v9 }
 0x168   : > { %834 = vst.msk [vmem:[%s1307_s14 + $0x168] sm:$0xff] %vm789_vm0, %v764_v10 }
 0x169   : > { %835 = vst [vmem:[%s1307_s14 + $0x170] sm:$0xff] %v588_v12 }
 0x16c   : > { %v676_v13 = vpop.f32.mrf.mxu2 }
 0x16d   : > { %v765_v14 = vpop.f32.mrf.mxu3  ;;  %v501_v15 = vpop.f32.mrf.mxu0 }
 0x16e   : > { %v766_v16 = vadd.f32 %v765_v14, %v676_v13  ;;  %v590_v17 = vpop.f32.mrf.mxu1 }
 0x16f   : > { %v591_v18 = vadd.f32 %v590_v17, %v501_v15 }
 0x170   : > { %836 = vst.msk [vmem:[%s1307_s14 + $0x178] sm:$0xff] %vm789_vm0, %v766_v16 }
 0x171   : > { %837 = vst [vmem:[%s1307_s14 + $0x180] sm:$0xff] %v591_v18 }
 0x174   : > { %v679_v19 = vpop.f32.mrf.mxu2 }
 0x175   : > { %v768_v20 = vpop.f32.mrf.mxu3  ;;  %v503_v21 = vpop.f32.mrf.mxu0 }
 0x176   : > { %v769_v22 = vadd.f32 %v768_v20, %v679_v19  ;;  %v592_v23 = vpop.f32.mrf.mxu1 }
 0x177   : > { %v593_v24 = vadd.f32 %v592_v23, %v503_v21 }
 0x178   : > { %838 = vst.msk [vmem:[%s1307_s14 + $0x188] sm:$0xff] %vm789_vm0, %v769_v22 }
 0x179   : > { %839 = vst [vmem:[%s1307_s14 + $0x190] sm:$0xff] %v593_v24 }
 0x17c   : > { %v681_v25 = vpop.f32.mrf.mxu2 }
 0x17d   : > { %v770_v26 = vpop.f32.mrf.mxu3  ;;  %v506_v27 = vpop.f32.mrf.mxu0 }
 0x17e   : > { %v771_v28 = vadd.f32 %v770_v26, %v681_v25  ;;  %v595_v29 = vpop.f32.mrf.mxu1 }
 0x17f   : > { %v596_v30 = vadd.f32 %v595_v29, %v506_v27 }
 0x180   : > { %840 = vst.msk [vmem:[%s1307_s14 + $0x198] sm:$0xff] %vm789_vm0, %v771_v28 }
 0x181   : > { %841 = vst [vmem:[%s1307_s14 + $0x1a0] sm:$0xff] %v596_v30 }
 0x184   : > { %v684_v31 = vpop.f32.mrf.mxu2 }
 0x185   : > { %v773_v32 = vpop.f32.mrf.mxu3  ;;  %v508_v33 = vpop.f32.mrf.mxu0 }
 0x186   : > { %v774_v34 = vadd.f32 %v773_v32, %v684_v31  ;;  %v597_v35 = vpop.f32.mrf.mxu1 }
 0x187   : > { %v598_v36 = vadd.f32 %v597_v35, %v508_v33 }
 0x188   : > { %842 = vst.msk [vmem:[%s1307_s14 + $0x1a8] sm:$0xff] %vm789_vm0, %v774_v34 }
 0x189   : > { %843 = vst [vmem:[%s1307_s14 + $0x1b0] sm:$0xff] %v598_v36 }
 0x18c   : > { %v686_v37 = vpop.f32.mrf.mxu2 }
 0x18d   : > { %v775_v38 = vpop.f32.mrf.mxu3  ;;  %v511_v39 = vpop.f32.mrf.mxu0 }
 0x18e   : > { %v776_v40 = vadd.f32 %v775_v38, %v686_v37  ;;  %v600_v41 = vpop.f32.mrf.mxu1 }
 0x18f   : > { %v601_v42 = vadd.f32 %v600_v41, %v511_v39 }
 0x190   : > { %844 = vst.msk [vmem:[%s1307_s14 + $0x1b8] sm:$0xff] %vm789_vm0, %v776_v40 }
 0x191   : > { %845 = vst [vmem:[%s1307_s14 + $0x1c0] sm:$0xff] %v601_v42 }
 0x194   : > { %v689_v43 = vpop.f32.mrf.mxu2 }
 0x195   : > { %v778_v44 = vpop.f32.mrf.mxu3  ;;  %v513_v45 = vpop.f32.mrf.mxu0 }
 0x196   : > { %v779_v46 = vadd.f32 %v778_v44, %v689_v43  ;;  %v602_v47 = vpop.f32.mrf.mxu1 }
 0x197   : > { %v603_v48 = vadd.f32 %v602_v47, %v513_v45 }
 0x198   : > { %846 = vst.msk [vmem:[%s1307_s14 + $0x1c8] sm:$0xff] %vm789_vm0, %v779_v46 }
 0x199   : > { %847 = vst [vmem:[%s1307_s14 + $0x1d0] sm:$0xff] %v603_v48 }
 0x19c   : > { %v691_v49 = vpop.f32.mrf.mxu2 }
 0x19d   : > { %v780_v50 = vpop.f32.mrf.mxu3  ;;  %v516_v51 = vpop.f32.mrf.mxu0 }
 0x19e   : > { %v781_v52 = vadd.f32 %v780_v50, %v691_v49  ;;  %v605_v53 = vpop.f32.mrf.mxu1 }
 0x19f   : > { %v606_v54 = vadd.f32 %v605_v53, %v516_v51 }
 0x1a0   : > { %848 = vst.msk [vmem:[%s1307_s14 + $0x1d8] sm:$0xff] %vm789_vm0, %v781_v52 }
 0x1a1   : > { %849 = vst [vmem:[%s1307_s14 + $0x1e0] sm:$0xff] %v606_v54 }
 0x1a4   : > { %v694_v55 = vpop.f32.mrf.mxu2 }
 0x1a5   : > { %v783_v56 = vpop.f32.mrf.mxu3  ;;  %v518_v57 = vpop.f32.mrf.mxu0 }
 0x1a6   : > { %v784_v58 = vadd.f32 %v783_v56, %v694_v55  ;;  %v607_v59 = vpop.f32.mrf.mxu1 }
 0x1a7   : > { %v608_v60 = vadd.f32 %v607_v59, %v518_v57 }
 0x1a8   : > { %850 = vst.msk [vmem:[%s1307_s14 + $0x1e8] sm:$0xff] %vm789_vm0, %v784_v58 }
 0x1a9   : > { %851 = vst [vmem:[%s1307_s14 + $0x1f0] sm:$0xff] %v608_v60 }
 0x1ac   : > { %v696_v61 = vpop.f32.mrf.mxu2 }
 0x1ad   : > { %v785_v62 = vpop.f32.mrf.mxu3 }
 0x1ae   : > { %v786_v63 = vadd.f32 %v785_v62, %v696_v61 }
 0x1b0   : > { %852 = vst.msk [vmem:[%s1307_s14 + $0x1f8] sm:$0xff] %vm789_vm0, %v786_v63 }
 0x1b1 PF: > { %s12_s9 = sadd.s32 1, %s1095_s9  }
 0x1b2   : > { %p9_p4 = scmp.ge.s32.totalorder %s12_s9, 4  }
 0x1b4   :  { %11 = sbr.rel (!%p9_p4) target bundleno = 1 (0x1), region = 58 }

</bundles_post_ra>
